<compile_context>
chip_gen: v7x
topology: tpu7x:2x2x1
jax: 0.10.0
libtpu: 0.0.40
codegen_flags: <defaults>
</compile_context>

<pallas_src>
import functools

import jax
import jax.numpy as jnp
from jax import lax
from jax.experimental import pallas as pl
from jax.experimental.pallas import tpu as pltpu


def dcrnn_model_kernel(x_ref, po_ref, pi_ref, s_ref,
                       wzh_ref, bzh_ref, wg_ref, bg_ref,
                       gamma_ref, beta_ref, wl_ref, bl_ref,
                       out_ref, *, K, Hc):
    f32 = jnp.float32
    bf16 = jnp.bfloat16

    X = x_ref[...]                                   # [N, F]  bf16
    P_O = po_ref[...]                                # [N, N]  bf16, row-normalized A
    P_I = pi_ref[...]                                # [N, N]  bf16, row-normalized A^T
    S = s_ref[...]                                   # [N, N]  bf16, sym-normalized A_hat

    def prop(P, Y_bf):                               # [N,N] @ [N,C] -> f32 [N,C]
        return jnp.dot(P, Y_bf, preferred_element_type=f32)

    # ---- DCRNN gates (h0 == 0): term-by-term accumulation, no basis concat ----
    ZH = bzh_ref[...] + jnp.dot(X, wzh_ref[0], preferred_element_type=f32)  # T0 term
    if K > 1:
        T1_o_f = prop(P_O, X)
        T1_i_f = prop(P_I, X)
        T1_o = T1_o_f.astype(bf16)                   # single bf16 copy per term
        T1_i = T1_i_f.astype(bf16)
        ZH = ZH + jnp.dot(T1_o, wzh_ref[1], preferred_element_type=f32)
        ZH = ZH + jnp.dot(T1_i, wzh_ref[2], preferred_element_type=f32)
        if K > 2:
            X_f = X.astype(f32)
            Tpp_o, Tpp_i = X_f, X_f                  # T_{k-2}  (f32)
            Tp_o_f, Tp_i_f = T1_o_f, T1_i_f          # T_{k-1}  (f32)
            Tp_o_b, Tp_i_b = T1_o, T1_i              # T_{k-1}  (bf16)
            for k in range(2, K):                    # static unroll; K is small
                Tc_o_f = 2.0 * prop(P_O, Tp_o_b) - Tpp_o
                Tc_i_f = 2.0 * prop(P_I, Tp_i_b) - Tpp_i
                Tc_o_b = Tc_o_f.astype(bf16)
                Tc_i_b = Tc_i_f.astype(bf16)
                ZH = ZH + jnp.dot(Tc_o_b, wzh_ref[2 * k - 1], preferred_element_type=f32)
                ZH = ZH + jnp.dot(Tc_i_b, wzh_ref[2 * k], preferred_element_type=f32)
                Tpp_o, Tpp_i = Tp_o_f, Tp_i_f
                Tp_o_f, Tp_i_f = Tc_o_f, Tc_i_f
                Tp_o_b, Tp_i_b = Tc_o_b, Tc_i_b

    Z = jax.nn.sigmoid(ZH[:, :Hc])
    H_tilde = jnp.tanh(ZH[:, Hc:])
    H = (1.0 - Z) * H_tilde                          # Z*h0 == 0; R never needed (h0 == 0)

    # ---- GCNConv (unit edge weights, normalization folded into S) ----
    HW = jnp.dot(H.astype(bf16), wg_ref[...], preferred_element_type=f32)
    G = jnp.dot(S, HW.astype(bf16), preferred_element_type=f32) + bg_ref[...]

    # ---- ReLU ----
    G = jnp.maximum(G, 0.0)

    # ---- BatchNorm1d over nodes (training-mode batch stats, biased variance) ----
    n = G.shape[0]
    mean = jnp.sum(G, axis=0, keepdims=True) / n
    cent = G - mean
    var = jnp.sum(cent * cent, axis=0, keepdims=True) / n
    Gn = cent * lax.rsqrt(var + 1e-5) * gamma_ref[...] + beta_ref[...]

    # TODO(synk): Dropout is stochastic; treated as identity (eval semantics) here.

    # ---- Linear(Hc -> 1), padded to 128 output lanes for a lane-dense store ----
    # TODO(synk): in a streamed/gridded large-N regime emit this pad in bf16 to
    # halve the writeback; kept f32 here for output precision at demo size.
    out_ref[...] = jnp.dot(Gn.astype(bf16), wl_ref[...],
                           preferred_element_type=f32) + bl_ref[...]


def init_params(key, node_features, hidden_channels, K):
    cin = node_features + hidden_channels
    ks = jax.random.split(key, 12)

    def u(k, shape, scale):
        return jax.random.uniform(k, shape, jnp.float32, -scale, scale)

    return {
        "wz": u(ks[0], (2, K, cin, hidden_channels), 0.2),
        "bz": u(ks[1], (1, hidden_channels), 0.2),
        "wr": u(ks[2], (2, K, cin, hidden_channels), 0.2),  # in the module; unused when h0==0
        "br": u(ks[3], (1, hidden_channels), 0.2),
        "wh": u(ks[4], (2, K, cin, hidden_channels), 0.2),
        "bh": u(ks[5], (1, hidden_channels), 0.2),
        "wg": u(ks[6], (hidden_channels, hidden_channels), 0.2),
        "bg": u(ks[7], (1, hidden_channels), 0.2),
        "gamma": jnp.ones((1, hidden_channels), jnp.float32),   # BN weight init = 1
        "beta": jnp.zeros((1, hidden_channels), jnp.float32),   # BN bias init = 0
        "wl": u(ks[10], (hidden_channels, 1), 0.2),
        "bl": u(ks[11], (1, 1), 0.2),
    }


@functools.lru_cache(maxsize=None)
def _vmem_limit_bytes():
    # Per-generation scoped-VMEM budget for the resident whole-array plan:
    # ~96 MiB on 128 MiB parts (v5e/v6e), ~48 MiB on 64 MiB v7x; ~25% headroom
    # left for compiler scratch / pipelined I/O buffers.
    try:
        info = pltpu.get_tpu_info()
        cap = int(getattr(info, "vmem_capacity_bytes", 64 * 1024 * 1024))
    except Exception:
        cap = 64 * 1024 * 1024
    return max(32 * 1024 * 1024, min((cap * 3) // 4, 100 * 1024 * 1024))


@functools.partial(jax.jit, static_argnames=("K",))
def dcrnn_model_forward(x, edge_index, edge_weight, params, K):
    N, F = x.shape
    Hc = params["wz"].shape[-1]
    f32 = jnp.float32
    bf16 = jnp.bfloat16

    # Glue (cheap XLA): densify the sparse graph.  A_T is built by swapping the
    # scatter indices, so no transpose op is emitted anywhere.
    w = edge_weight.astype(f32)
    A = jnp.zeros((N, N), f32).at[edge_index[0], edge_index[1]].add(w)
    A_T = jnp.zeros((N, N), f32).at[edge_index[1], edge_index[0]].add(w)
    A_unw = jnp.zeros((N, N), f32).at[edge_index[0], edge_index[1]].set(1.0)
    A_hat = A_unw + jnp.eye(N, dtype=f32)

    # Degree normalizations folded directly into the operators in f32 here,
    # fusing into the bf16 cast (no per-order VPU scaling inside the kernel).
    # Guards keep isolated nodes from producing inf/NaN.
    deg_out = jnp.sum(A, axis=1, keepdims=True)
    deg_in = jnp.sum(A, axis=0, keepdims=True).T
    inv_do = jnp.where(deg_out > 0, 1.0 / jnp.maximum(deg_out, 1e-12), 0.0)
    inv_di = jnp.where(deg_in > 0, 1.0 / jnp.maximum(deg_in, 1e-12), 0.0)
    dh_r = jnp.sum(A_hat, axis=1, keepdims=True)
    dh_c = jnp.sum(A_hat, axis=0, keepdims=True).T
    d_r = jnp.where(dh_r > 0, lax.rsqrt(jnp.maximum(dh_r, 1e-12)), 0.0)
    d_c = jnp.where(dh_c > 0, lax.rsqrt(jnp.maximum(dh_c, 1e-12)), 0.0)

    P_O = inv_do * A                     # D_out^-1 A
    P_I = inv_di * A_T                   # D_in^-1  A^T
    S = (d_r * A_hat) * d_c.T            # D_r^-1/2 A_hat D_c^-1/2

    # h0 == 0  =>  only the X-half of each gate weight contributes; the reset
    # gate R is irrelevant (H0*R == 0) and Z*H0 == 0.  Stack the per-(direction,
    # order) Z|H~ weight blocks as [2K-1, F, 2*Hc] matching the in-kernel
    # term order [T0(combined), T1_O, T1_I, T2_O, T2_I, ...].
    wz_x = params["wz"][:, :, :F, :]
    wh_x = params["wh"][:, :, :F, :]
    blocks = [jnp.concatenate([wz_x[0, 0] + wz_x[1, 0],
                               wh_x[0, 0] + wh_x[1, 0]], axis=1)]
    for k in range(1, K):
        blocks.append(jnp.concatenate([wz_x[0, k], wh_x[0, k]], axis=1))
        blocks.append(jnp.concatenate([wz_x[1, k], wh_x[1, k]], axis=1))
    w_zh = jnp.stack(blocks, axis=0)                       # [2K-1, F, 2*Hc]
    b_zh = jnp.concatenate([params["bz"], params["bh"]], axis=1)

    # Lane-dense output: pad Linear(Hc->1) to 128 output lanes; column 0 is the result.
    wl_pad = jnp.zeros((Hc, 128), f32).at[:, :1].set(params["wl"])
    bl_pad = jnp.zeros((1, 128), f32).at[:, :1].set(params["bl"])

    kernel = functools.partial(dcrnn_model_kernel, K=K, Hc=Hc)
    vmem = pl.BlockSpec(memory_space=pltpu.MemorySpace.VMEM)
    out = pl.pallas_call(
        kernel,
        out_shape=jax.ShapeDtypeStruct((N, 128), f32),
        in_specs=[vmem] * 12,
        out_specs=vmem,
        # TODO(synk): for N beyond the resident-adjacency cutoff (~3000 on v7x's
        # 64 MiB VMEM, ~4000 on v5e/v6e), switch to a gridded plan: keep the
        # narrow [N, <=2*Hc] feature matrices resident, stream [tile_N, N] row
        # panels of P_O/P_I/S from HBM (memory_space=pl.ANY, Buffered(2-3),
        # tile_N multiple of 256 on v6e/v7x and 128 on v5e), mark the node axis
        # "parallel" for v7x's two TensorCores, and give BatchNorm a two-phase
        # (accumulate sum/sumsq per block, finalize) treatment.
        compiler_params=pltpu.CompilerParams(vmem_limit_bytes=_vmem_limit_bytes()),
    )(x.astype(bf16), P_O.astype(bf16), P_I.astype(bf16), S.astype(bf16),
      w_zh.astype(bf16), b_zh, params["wg"].astype(bf16), params["bg"],
      params["gamma"], params["beta"], wl_pad.astype(bf16), bl_pad)
    return out[:, :1]


if __name__ == "__main__":
    N, F, Hc, K = 16, 4, 32, 2
    key = jax.random.PRNGKey(0)
    kx, kw, kp = jax.random.split(key, 3)

    x = jax.random.normal(kx, (N, F), jnp.float32)

    # Undirected ring graph (both directions), so every node has in/out degree > 0.
    src = jnp.arange(N, dtype=jnp.int32)
    dst = (src + 1) % N
    edge_index = jnp.concatenate(
        [jnp.stack([src, dst]), jnp.stack([dst, src])], axis=1)          # [2, 2N]
    edge_weight = jax.random.uniform(kw, (edge_index.shape[1],), jnp.float32, 0.5, 1.5)

    params = init_params(kp, F, Hc, K)

    out = dcrnn_model_forward(x, edge_index, edge_weight, params, K=K)
    out = jax.block_until_ready(out)
    assert out.shape == (N, 1)
    assert bool(jnp.all(jnp.isfinite(out)))
    print("KERNEL_OK")
</pallas_src>

<mosaic_0001>
module attributes {stable_mosaic.version = 11 : i64} {
  func.func private @main(%arg0: i32) attributes {dimension_semantics = [#tpu.dimension_semantics<core_parallel>], iteration_bounds = array<i64: 2>, tpu.core_type = #tpu.core_type<sc_scalar_subcore>, window_params = []} {
    return
  }
}

module attributes {stable_mosaic.version = 11 : i64} {
  func.func private @main(%arg0: i32) attributes {dimension_semantics = [#tpu.dimension_semantics<core_parallel>], iteration_bounds = array<i64: 2>, tpu.core_type = #tpu.core_type<sc_scalar_subcore>, window_params = []} {
    return
  }
}

module attributes {stable_mosaic.version = 11 : i64} {
  func.func @dcrnn_model_kernel(%arg0: memref<16x4xbf16, #tpu.memory_space<vmem>>, %arg1: memref<16x16xbf16, #tpu.memory_space<vmem>>, %arg2: memref<16x16xbf16, #tpu.memory_space<vmem>>, %arg3: memref<16x16xbf16, #tpu.memory_space<vmem>>, %arg4: memref<3x4x64xbf16, #tpu.memory_space<vmem>>, %arg5: memref<1x64xf32, #tpu.memory_space<vmem>>, %arg6: memref<32x32xbf16, #tpu.memory_space<vmem>>, %arg7: memref<1x32xf32, #tpu.memory_space<vmem>>, %arg8: memref<1x32xf32, #tpu.memory_space<vmem>>, %arg9: memref<1x32xf32, #tpu.memory_space<vmem>>, %arg10: memref<32x128xbf16, #tpu.memory_space<vmem>>, %arg11: memref<1x128xf32, #tpu.memory_space<vmem>>, %arg12: memref<16x128xf32, #tpu.memory_space<vmem>>) attributes {dimension_semantics = [], scalar_prefetch = 0 : i64, scratch_operands = 0 : i64, tpu.core_type = #tpu.core_type<tc>} {
    %c0 = arith.constant 0 : index
    %c0_0 = arith.constant 0 : index
    %0 = vector.load %arg0[%c0, %c0_0] : memref<16x4xbf16, #tpu.memory_space<vmem>>, vector<16x4xbf16>
    %c0_1 = arith.constant 0 : index
    %c0_2 = arith.constant 0 : index
    %1 = vector.load %arg1[%c0_1, %c0_2] : memref<16x16xbf16, #tpu.memory_space<vmem>>, vector<16x16xbf16>
    %c0_3 = arith.constant 0 : index
    %c0_4 = arith.constant 0 : index
    %2 = vector.load %arg2[%c0_3, %c0_4] : memref<16x16xbf16, #tpu.memory_space<vmem>>, vector<16x16xbf16>
    %c0_5 = arith.constant 0 : index
    %c0_6 = arith.constant 0 : index
    %3 = vector.load %arg3[%c0_5, %c0_6] : memref<16x16xbf16, #tpu.memory_space<vmem>>, vector<16x16xbf16>
    %c0_7 = arith.constant 0 : index
    %c0_8 = arith.constant 0 : index
    %4 = vector.load %arg5[%c0_7, %c0_8] : memref<1x64xf32, #tpu.memory_space<vmem>>, vector<1x64xf32>
    %c0_9 = arith.constant 0 : index
    %c0_10 = arith.constant 0 : index
    %c0_11 = arith.constant 0 : index
    %5 = vector.load %arg4[%c0_9, %c0_10, %c0_11] : memref<3x4x64xbf16, #tpu.memory_space<vmem>>, vector<1x4x64xbf16>
    %6 = vector.shape_cast %5 : vector<1x4x64xbf16> to vector<4x64xbf16>
    %cst = arith.constant dense<0.000000e+00> : vector<16x64xf32>
    %7 = tpu.matmul %0, %6, %cst {dimension_numbers = #tpu.dot_dimension_numbers<[1], [0], [0], [1], [0, 0, 1, 1], [], []>} : vector<16x4xbf16>, vector<4x64xbf16>, vector<16x64xf32> -> vector<16x64xf32>
    %8 = vector.broadcast %4 : vector<1x64xf32> to vector<16x64xf32>
    %9 = arith.addf %8, %7 : vector<16x64xf32>
    %cst_12 = arith.constant dense<0.000000e+00> : vector<16x4xf32>
    %10 = tpu.matmul %1, %0, %cst_12 {dimension_numbers = #tpu.dot_dimension_numbers<[1], [0], [0], [1], [0, 0, 1, 1], [], []>} : vector<16x16xbf16>, vector<16x4xbf16>, vector<16x4xf32> -> vector<16x4xf32>
    %cst_13 = arith.constant dense<0.000000e+00> : vector<16x4xf32>
    %11 = tpu.matmul %2, %0, %cst_13 {dimension_numbers = #tpu.dot_dimension_numbers<[1], [0], [0], [1], [0, 0, 1, 1], [], []>} : vector<16x16xbf16>, vector<16x4xbf16>, vector<16x4xf32> -> vector<16x4xf32>
    %12 = arith.truncf %10 : vector<16x4xf32> to vector<16x4xbf16>
    %13 = arith.truncf %11 : vector<16x4xf32> to vector<16x4xbf16>
    %c1 = arith.constant 1 : index
    %c0_14 = arith.constant 0 : index
    %c0_15 = arith.constant 0 : index
    %14 = vector.load %arg4[%c1, %c0_14, %c0_15] : memref<3x4x64xbf16, #tpu.memory_space<vmem>>, vector<1x4x64xbf16>
    %15 = vector.shape_cast %14 : vector<1x4x64xbf16> to vector<4x64xbf16>
    %cst_16 = arith.constant dense<0.000000e+00> : vector<16x64xf32>
    %16 = tpu.matmul %12, %15, %cst_16 {dimension_numbers = #tpu.dot_dimension_numbers<[1], [0], [0], [1], [0, 0, 1, 1], [], []>} : vector<16x4xbf16>, vector<4x64xbf16>, vector<16x64xf32> -> vector<16x64xf32>
    %17 = arith.addf %9, %16 : vector<16x64xf32>
    %c2 = arith.constant 2 : index
    %c0_17 = arith.constant 0 : index
    %c0_18 = arith.constant 0 : index
    %18 = vector.load %arg4[%c2, %c0_17, %c0_18] : memref<3x4x64xbf16, #tpu.memory_space<vmem>>, vector<1x4x64xbf16>
    %19 = vector.shape_cast %18 : vector<1x4x64xbf16> to vector<4x64xbf16>
    %cst_19 = arith.constant dense<0.000000e+00> : vector<16x64xf32>
    %20 = tpu.matmul %13, %19, %cst_19 {dimension_numbers = #tpu.dot_dimension_numbers<[1], [0], [0], [1], [0, 0, 1, 1], [], []>} : vector<16x4xbf16>, vector<4x64xbf16>, vector<16x64xf32> -> vector<16x64xf32>
    %21 = arith.addf %17, %20 : vector<16x64xf32>
    %22 = vector.extract_strided_slice %21 {offsets = [0, 0], sizes = [16, 32], strides = [1, 1]} : vector<16x64xf32> to vector<16x32xf32>
    %23 = arith.negf %22 : vector<16x32xf32>
    %24 = math.exp %23 : vector<16x32xf32>
    %cst_20 = arith.constant 1.000000e+00 : f32
    %25 = vector.broadcast %cst_20 : f32 to vector<16x32xf32>
    %26 = arith.addf %25, %24 : vector<16x32xf32>
    %27 = arith.divf %25, %26 : vector<16x32xf32>
    %28 = vector.extract_strided_slice %21 {offsets = [0, 32], sizes = [16, 32], strides = [1, 1]} : vector<16x64xf32> to vector<16x32xf32>
    %29 = math.tanh %28 : vector<16x32xf32>
    %cst_21 = arith.constant 1.000000e+00 : f32
    %30 = vector.broadcast %cst_21 : f32 to vector<16x32xf32>
    %31 = arith.subf %30, %27 : vector<16x32xf32>
    %32 = arith.mulf %31, %29 : vector<16x32xf32>
    %33 = arith.truncf %32 : vector<16x32xf32> to vector<16x32xbf16>
    %c0_22 = arith.constant 0 : index
    %c0_23 = arith.constant 0 : index
    %34 = vector.load %arg6[%c0_22, %c0_23] : memref<32x32xbf16, #tpu.memory_space<vmem>>, vector<32x32xbf16>
    %cst_24 = arith.constant dense<0.000000e+00> : vector<16x32xf32>
    %35 = tpu.matmul %33, %34, %cst_24 {dimension_numbers = #tpu.dot_dimension_numbers<[1], [0], [0], [1], [0, 0, 1, 1], [], []>} : vector<16x32xbf16>, vector<32x32xbf16>, vector<16x32xf32> -> vector<16x32xf32>
    %36 = arith.truncf %35 : vector<16x32xf32> to vector<16x32xbf16>
    %cst_25 = arith.constant dense<0.000000e+00> : vector<16x32xf32>
    %37 = tpu.matmul %3, %36, %cst_25 {dimension_numbers = #tpu.dot_dimension_numbers<[1], [0], [0], [1], [0, 0, 1, 1], [], []>} : vector<16x16xbf16>, vector<16x32xbf16>, vector<16x32xf32> -> vector<16x32xf32>
    %c0_26 = arith.constant 0 : index
    %c0_27 = arith.constant 0 : index
    %38 = vector.load %arg7[%c0_26, %c0_27] : memref<1x32xf32, #tpu.memory_space<vmem>>, vector<1x32xf32>
    %39 = vector.broadcast %38 : vector<1x32xf32> to vector<16x32xf32>
    %40 = arith.addf %37, %39 : vector<16x32xf32>
    %cst_28 = arith.constant 0.000000e+00 : f32
    %41 = vector.broadcast %cst_28 : f32 to vector<16x32xf32>
    %42 = arith.maximumf %40, %41 : vector<16x32xf32>
    %cst_29 = arith.constant dense<0.000000e+00> : vector<32xf32>
    %43 = vector.multi_reduction <add>, %42, %cst_29 [0] : vector<16x32xf32> to vector<32xf32>
    %44 = vector.shape_cast %43 : vector<32xf32> to vector<1x32xf32>
    %cst_30 = arith.constant 1.600000e+01 : f32
    %45 = vector.broadcast %cst_30 : f32 to vector<1x32xf32>
    %46 = arith.divf %44, %45 : vector<1x32xf32>
    %47 = vector.broadcast %46 : vector<1x32xf32> to vector<16x32xf32>
    %48 = arith.subf %42, %47 : vector<16x32xf32>
    %49 = arith.mulf %48, %48 : vector<16x32xf32>
    %cst_31 = arith.constant dense<0.000000e+00> : vector<32xf32>
    %50 = vector.multi_reduction <add>, %49, %cst_31 [0] : vector<16x32xf32> to vector<32xf32>
    %51 = vector.shape_cast %50 : vector<32xf32> to vector<1x32xf32>
    %cst_32 = arith.constant 1.600000e+01 : f32
    %52 = vector.broadcast %cst_32 : f32 to vector<1x32xf32>
    %53 = arith.divf %51, %52 : vector<1x32xf32>
    %cst_33 = arith.constant 9.99999974E-6 : f32
    %54 = vector.broadcast %cst_33 : f32 to vector<1x32xf32>
    %55 = arith.addf %53, %54 : vector<1x32xf32>
    %56 = math.rsqrt %55 : vector<1x32xf32>
    %57 = vector.broadcast %56 : vector<1x32xf32> to vector<16x32xf32>
    %58 = arith.mulf %48, %57 : vector<16x32xf32>
    %c0_34 = arith.constant 0 : index
    %c0_35 = arith.constant 0 : index
    %59 = vector.load %arg8[%c0_34, %c0_35] : memref<1x32xf32, #tpu.memory_space<vmem>>, vector<1x32xf32>
    %60 = vector.broadcast %59 : vector<1x32xf32> to vector<16x32xf32>
    %61 = arith.mulf %58, %60 : vector<16x32xf32>
    %c0_36 = arith.constant 0 : index
    %c0_37 = arith.constant 0 : index
    %62 = vector.load %arg9[%c0_36, %c0_37] : memref<1x32xf32, #tpu.memory_space<vmem>>, vector<1x32xf32>
    %63 = vector.broadcast %62 : vector<1x32xf32> to vector<16x32xf32>
    %64 = arith.addf %61, %63 : vector<16x32xf32>
    %65 = arith.truncf %64 : vector<16x32xf32> to vector<16x32xbf16>
    %c0_38 = arith.constant 0 : index
    %c0_39 = arith.constant 0 : index
    %66 = vector.load %arg10[%c0_38, %c0_39] : memref<32x128xbf16, #tpu.memory_space<vmem>>, vector<32x128xbf16>
    %cst_40 = arith.constant dense<0.000000e+00> : vector<16x128xf32>
    %67 = tpu.matmul %65, %66, %cst_40 {dimension_numbers = #tpu.dot_dimension_numbers<[1], [0], [0], [1], [0, 0, 1, 1], [], []>} : vector<16x32xbf16>, vector<32x128xbf16>, vector<16x128xf32> -> vector<16x128xf32>
    %c0_41 = arith.constant 0 : index
    %c0_42 = arith.constant 0 : index
    %68 = vector.load %arg11[%c0_41, %c0_42] : memref<1x128xf32, #tpu.memory_space<vmem>>, vector<1x128xf32>
    %69 = vector.broadcast %68 : vector<1x128xf32> to vector<16x128xf32>
    %70 = arith.addf %67, %69 : vector<16x128xf32>
    %c0_43 = arith.constant 0 : index
    %c0_44 = arith.constant 0 : index
    %71 = vector.load %arg12[%c0_43, %c0_44] : memref<16x128xf32, #tpu.memory_space<vmem>>, vector<16x128xf32>
    tpu.vector_store %arg12[%c0_43, %c0_44], %70 {strides = array<i32>} : memref<16x128xf32, #tpu.memory_space<vmem>>, vector<16x128xf32>,
    return
  }
}

</mosaic_0001>

<bundles_post_ra>
// kernel: dcrnn_model_forward.1
= control target key start
LH: loop header
LB: loop body
LE: loop exit
PB: predicated region body
PF: predicated region fallthrough
CT: control target
= control target key end

     0   :  { %vm61_vm0 = vcmask 1041408   ;;  %v716_v0 = vmov 0.0   ;;  %vm120_vm1 = vcmask 130048   ;;  %vm717_vm2 = vmmov 0   ;;  %s879_s0 = inlined_call_operand.vmem [shape: bf16[16,4], index: 0, kind: input, shape index: {}]   ;;  %s880_s4 = inlined_call_operand.vmem [shape: bf16[3,4,64], index: 4, kind: input, shape index: {}]   ;;  %s881_s1 = inlined_call_operand.vmem [shape: bf16[16,16], index: 1, kind: input, shape index: {}]   ;;  %s882_s2 = inlined_call_operand.vmem [shape: bf16[16,16], index: 2, kind: input, shape index: {}]   ;;  %s883_s5 = inlined_call_operand.vmem [shape: f32[1,64], index: 5, kind: input, shape index: {}]   ;;  %s884_s6 = inlined_call_operand.vmem [shape: bf16[32,32], index: 6, kind: input, shape index: {}]   ;;  %s885_s3 = inlined_call_operand.vmem [shape: bf16[16,16], index: 3, kind: input, shape index: {}]   ;;  %s886_s10 = inlined_call_operand.vmem [shape: bf16[32,128], index: 10, kind: input, shape index: {}]   ;;  %s887_s7 = inlined_call_operand.vmem [shape: f32[1,32], index: 7, kind: input, shape index: {}]   ;;  %s888_s8 = inlined_call_operand.vmem [shape: f32[1,32], index: 8, kind: input, shape index: {}]   ;;  %s889_s9 = inlined_call_operand.vmem [shape: f32[1,32], index: 9, kind: input, shape index: {}]   ;;  %s890_s11 = inlined_call_operand.vmem [shape: f32[1,128], index: 11, kind: input, shape index: {}]   ;;  %s891_s12 = inlined_call_operand.vmem [shape: f32[16,128], index: 12, kind: output, shape index: {}]  }
   0x1   :  { %635 = vmatprep.subr.bf16.mxu1 %v716_v0  ;;  %629 = vmatprep.subr.bf16.mxu0 %v716_v0  ;;  %v694_v1 = vld [vmem:[%s879_s0] sm:$0xff]   ;;  %vm57_vm3 = vcmask 31744   ;;  %v698_v28 = vld [vmem:[%s884_s6 + $0x8] sm:$0xff]   ;;  %vm361_vm4 = vcmask 261120  }
   0x2   :  { %v51_v2 = vld [vmem:[%s880_s4] sm:$0x3]  ;;  %637 = vmatprep.mubr.msk.bf16.mxu1 %vm717_vm2, %v716_v0  ;;  %631 = vmatprep.mubr.msk.bf16.mxu0 %vm717_vm2, %v716_v0  ;;  %v593_v6 = vld [vmem:[%s880_s4 + $0x2] sm:$0x3]  ;;  %v595_v9 = vld [vmem:[%s880_s4 + $0x4] sm:$0x3] }
   0x3   :  { %636 = vmatpush3.bf16.msra.mxu1 %v694_v1  ;;  %v63_v3 = vsel %vm61_vm0, %v51_v2, 0  ;;  %v695_v4 = vld [vmem:[%s881_s1] sm:$0xff]   ;;  %v222_v7 = vsel %vm61_vm0, %v593_v6, 0  ;;  %v273_v14 = vsel %vm61_vm0, %v595_v9, 0  ;;  %v701_v53 = vld [vmem:[%s886_s10 + $0x8] sm:$0xff]  }
   0x4   :  { %630 = vmatpush3.bf16.msra.mxu0 %v63_v3  ;;  %659 = vmatprep.subr.bf16.mxu1 %v716_v0  ;;  %v696_v5 = vld [vmem:[%s882_s2] sm:$0xff]  }
   0x5   :  { %641 = vmatprep.subr.bf16.mxu0 %v716_v0  ;;  %v588_v20 = vld [vmem:[%s883_s5] ss:$0 sm:$0xff]  ;;  %s718_s5 = smov 96  }
   0x6   :  { %638 = vmatmul.mubr.msk.bf16.vlgmr.msra.gmra.mrb[0].mxu1 %vm120_vm1, %v695_v4  ;;  %v697_v24 = vld [vmem:[%s884_s6] sm:$0xff]  }
   0x7   :  { %632 = vmatmul.mubr.msk.bf16.vlgmr.msra.gmra.mrb[0].mxu0 %vm57_vm3, %v694_v1  ;;  %663 = vmatprep.mubr.msk.bf16.mxu1 %vm717_vm2, %v716_v0  ;;  %v699_v51 = vld [vmem:[%s885_s3] sm:$0xff]  }
   0x8   :  { %642 = vmatpush3.bf16.msra.mxu0 %v694_v1  ;;  %643 = vmatprep.mubr.msk.bf16.mxu0 %vm717_vm2, %v716_v0  ;;  %v700_v52 = vld [vmem:[%s886_s10] sm:$0xff]  }
   0x9   :  { %647 = vmatprep.subr.bf16.mxu0 %v716_v0  ;;  %660 = vmatpush3.bf16.msra.mxu1 %v697_v24  ;;  %v602_v54 = vld [vmem:[%s887_s7] ss:$0 sm:$0xff] }
   0xa   :  { %661 = vmatprep.subr.bf16.mxu1 %v716_v0 }
   0xd   :  { %662 = vmatpush3.bf16.msra.mxu1 %v698_v28  ;;  %v606_v28 = vld [vmem:[%s889_s9] ss:$0 sm:$0xff] }
   0xe   :  { %667 = vmatprep.subr.bf16.mxu1 %v716_v0 }
   0xf   :  { %644 = vmatmul.mubr.msk.bf16.vlgmr.msra.gmra.mrb[4].mxu0 %vm120_vm1, %v696_v5 }
  0x10   :  { %649 = vmatprep.mubr.msk.bf16.mxu0 %vm717_vm2, %v716_v0  ;;  %648 = vmatpush3.bf16.msra.mxu0 %v222_v7 }
  0x11   :  { %653 = vmatprep.subr.bf16.mxu0 %v716_v0 }
  0xd9   :  { %v158_v8 = vpop.f32.mrb[0].mxu1 }
  0xda   :  { %v639_v10 = vpop.f32.mrb[1].mxu1 }
  0xdb   :  { %v161_v11 = vpop.f32.mrb[2].mxu1 }
  0xdc   :  { %v214_v12 = vpack.c.bf16 %v161_v11, %v158_v8  ;;  %v640_v13 = vpop.f32.mrb[3].mxu1 }
  0xde   :  { %650 = vmatmul.mubr.msk.bf16.vlgmr.msra.gmra.mrb[0].mxu0 %vm57_vm3, %v214_v12 }
  0xdf   :  { %654 = vmatpush3.bf16.msra.mxu0 %v273_v14  ;;  %655 = vmatprep.mubr.msk.bf16.mxu0 %vm717_vm2, %v716_v0 }
  0xe2   :  { %v207_v15 = vpop.f32.mrb[4].mxu0 }
  0xe3   :  { %v645_v16 = vpop.f32.mrb[5].mxu0 }
  0xe4   :  { %v210_v17 = vpop.f32.mrb[6].mxu0 }
  0xe5   :  { %v215_v18 = vpack.c.bf16 %v210_v17, %v207_v15  ;;  %v646_v19 = vpop.f32.mrb[7].mxu0 }
  0xea   :  { %656 = vmatmul.mubr.msk.bf16.vlgmr.msra.gmra.mrb[0].mxu0 %vm57_vm3, %v215_v18 }
 0x1bd   :  { %v309_v21 = vpop.f32.mrb[0].mxu0 }
 0x1be   :  { %v681_v22 = vadd.f32 %v588_v20, %v309_v21  ;;  %v657_v23 = vpop.f32.mrb[1].mxu0 }
 0x1bf   :  { %v312_v25 = vpop.f32.mrb[2].mxu0 }
 0x1c0   :  { %702 = vtanh.f32 %v681_v22  ;;  %v682_v26 = vadd.f32 %v588_v20, %v312_v25  ;;  %v658_v27 = vpop.f32.mrb[3].mxu0  ;;  %v597_v31 = vmul.f32 -1.442695, %v681_v22  ;;  %v605_v25 = vld [vmem:[%s888_s8] ss:$0 sm:$0xff] }
 0x1c2   :  { %704 = vtanh.f32 %v682_v26  ;;  %v598_v32 = vmul.f32 -1.442695, %v682_v26 }
 0x1c3   :  { %706 = vpow2.f32 %v597_v31 }
 0x1c4   :  { %708 = vpow2.f32 %v598_v32 }
 0x1ca   :  { %v703_v29 = vpop.eup %702 }
 0x1cb   :  { %336 = vrot.lane.b32.xlu0 %v703_v29, %s718_s5 }
 0x1cc   :  { %v705_v30 = vpop.eup %704 }
 0x1cd   :  { %v707_v33 = vpop.eup %706 }
 0x1ce   :  { %v709_v34 = vpop.eup %708  ;;  %v324_v35 = vadd.f32 1.0, %v707_v33 }
 0x1cf   :  { %338 = vrot.lane.b32.xlu0 %v705_v30, %s718_s5  ;;  %v325_v36 = vadd.f32 1.0, %v709_v34  ;;  %v607_v34 = vld [vmem:[%s890_s11] ss:$0 sm:$0xff] }
 0x1d0   :  { %710 = vrcp.f32 %v324_v35 }
 0x1d1   :  { %712 = vrcp.f32 %v325_v36 }
 0x1da   :  { %v711_v37 = vpop.eup %710 }
 0x1db   :  { %v713_v38 = vpop.eup %712  ;;  %v332_v40 = vsub.f32 1.0, %v711_v37 }
 0x1dc   :  { %v333_v41 = vsub.f32 1.0, %v713_v38 }
 0x23d   :  { %v337_v39 = vpop.permute.xlu0 %336 }
 0x23e   :  { %v342_v43 = vmul.f32 %v337_v39, %v332_v40 }
 0x241   :  { %v339_v42 = vpop.permute.xlu0 %338 }
 0x242   :  { %v343_v44 = vmul.f32 %v339_v42, %v333_v41 }
 0x244   :  { %v344_v45 = vpack.c.bf16 %v343_v44, %v342_v43 }
 0x246   :  { %664 = vmatmul.mubr.msk.bf16.vlgmr.msra.gmra.mrb[4].mxu1 %vm361_vm4, %v344_v45 }
 0x247   :  { %669 = vmatprep.mubr.msk.bf16.mxu1 %vm717_vm2, %v716_v0 }
 0x319   :  { %v399_v46 = vpop.f32.mrb[4].mxu1 }
 0x31a   :  { %v665_v47 = vpop.f32.mrb[5].mxu1 }
 0x31b   :  { %v402_v48 = vpop.f32.mrb[6].mxu1 }
 0x31c   :  { %v406_v49 = vpack.c.bf16 %v402_v48, %v399_v46  ;;  %v666_v50 = vpop.f32.mrb[7].mxu1 }
 0x31e   :  { %668 = vmatpush3.bf16.msra.mxu1 %v406_v49 }
 0x31f   :  { %673 = vmatprep.subr.bf16.mxu1 %v716_v0 }
 0x321   :  { %670 = vmatmul.mubr.msk.bf16.vlgmr.msra.gmra.mrb[8].mxu1 %vm120_vm1, %v699_v51 }
 0x322   :  { %677 = vmatprep.mubr.msk.bf16.mxu1 %vm717_vm2, %v716_v0  ;;  %674 = vmatpush3.bf16.msra.mxu1 %v700_v52 }
 0x323   :  { %675 = vmatprep.subr.bf16.mxu1 %v716_v0 }
 0x326   :  { %676 = vmatpush3.bf16.msra.mxu1 %v701_v53 }
 0x3f4   :  { %v456_v55 = vpop.f32.mrb[8].mxu1 }
 0x3f5   :  { %v457_v56 = vadd.f32 %v602_v54, %v456_v55  ;;  %v671_v57 = vpop.f32.mrb[9].mxu1 }
 0x3f6   :  { %v459_v58 = vpop.f32.mrb[10].mxu1 }
 0x3f7   :  { %v463_v59 = vmax.f32 %v457_v56, 0.0  ;;  %v460_v60 = vadd.f32 %v602_v54, %v459_v58  ;;  %v672_v61 = vpop.f32.mrb[11].mxu1 }
 0x3f9   :  { %v464_v62 = vmax.f32 %v460_v60, 0.0  ;;  %v465_v63 = vsel %vm361_vm4, %v463_v59, 0.0 }
 0x3fb   :  { %v466_v0 = vsel %vm361_vm4, %v464_v62, 0.0 }
 0x3fc   :  { %v467_v1 = vadd.f32 %v466_v0, %v465_v63 }
 0x3fe   :  { %v468_v2 = vrot.slane %v467_v1, 4 }
 0x400   :  { %v469_v3 = vadd.f32 %v468_v2, %v467_v1 }
 0x402   :  { %v470_v4 = vrot.slane %v469_v3, 2 }
 0x404   :  { %v471_v5 = vadd.f32 %v470_v4, %v469_v3 }
 0x406   :  { %v472_v6 = vrot.slane %v471_v5, 1 }
 0x408   :  { %v473_v7 = vadd.f32 %v472_v6, %v471_v5 }
 0x40a   :  { %v475_v8 = vmul.f32 0.0625, %v473_v7 }
 0x40c   :  { %v476_v9 = vsub.f32 %v463_v59, %v475_v8  ;;  %v477_v10 = vsub.f32 %v464_v62, %v475_v8 }
 0x40e   :  { %v478_v11 = vmul.f32 %v476_v9, %v476_v9  ;;  %v479_v12 = vmul.f32 %v477_v10, %v477_v10 }
 0x410   :  { %v480_v13 = vsel %vm361_vm4, %v478_v11, 0.0  ;;  %v481_v14 = vsel %vm361_vm4, %v479_v12, 0.0 }
 0x411   :  { %v482_v15 = vadd.f32 %v481_v14, %v480_v13 }
 0x413   :  { %v483_v16 = vrot.slane %v482_v15, 4 }
 0x415   :  { %v484_v17 = vadd.f32 %v483_v16, %v482_v15 }
 0x417   :  { %v485_v18 = vrot.slane %v484_v17, 2 }
 0x419   :  { %v486_v19 = vadd.f32 %v485_v18, %v484_v17 }
 0x41b   :  { %v487_v20 = vrot.slane %v486_v19, 1 }
 0x41d   :  { %v488_v21 = vadd.f32 %v487_v20, %v486_v19 }
 0x41f   :  { %v489_v22 = vmul.f32 0.0625, %v488_v21 }
 0x421   :  { %v490_v23 = vadd.f32 1e-05, %v489_v22 }
 0x423   :  { %714 = vrsqrt.f32 %v490_v23 }
 0x42d   :  { %v715_v24 = vpop.eup %714 }
 0x42e   :  { %v492_v26 = vmul.f32 %v715_v24, %v476_v9  ;;  %v493_v27 = vmul.f32 %v715_v24, %v477_v10 }
 0x430   :  { %v501_v29 = vmul.f32 %v605_v25, %v492_v26  ;;  %v502_v30 = vmul.f32 %v605_v25, %v493_v27 }
 0x432   :  { %v510_v31 = vadd.f32 %v606_v28, %v501_v29  ;;  %v511_v32 = vadd.f32 %v606_v28, %v502_v30 }
 0x434   :  { %v512_v33 = vpack.c.bf16 %v511_v32, %v510_v31 }
 0x436   :  { %678 = vmatmul.mubr.msk.bf16.vlgmr.msra.gmra.mrb[12].mxu1 %vm361_vm4, %v512_v33 }
 0x509   :  { %v573_v35 = vpop.f32.mrb[12].mxu1 }
 0x50a   :  { %v574_v36 = vadd.f32 %v607_v34, %v573_v35  ;;  %v679_v37 = vpop.f32.mrb[13].mxu1 }
 0x50b   :  { %v576_v38 = vpop.f32.mrb[14].mxu1 }
 0x50c   :  { %580 = vst [vmem:[%s891_s12] sm:$0xff] %v574_v36  ;;  %v577_v39 = vadd.f32 %v607_v34, %v576_v38  ;;  %v680_v40 = vpop.f32.mrb[15].mxu1 }
 0x50e   :  { %581 = vst [vmem:[%s891_s12 + $0x8] sm:$0xff] %v577_v39 }

</bundles_post_ra>
